<compile_context>
chip_gen: v6e
topology: v6e:2x2x1
jax: 0.10.0
libtpu: 0.0.40
codegen_flags: <defaults>
</compile_context>

<pallas_src>
import jax
import jax.numpy as jnp
from jax.experimental import pallas as pl
from jax.experimental.pallas import tpu as pltpu


_EPS = 1e-6


# ---------------------------------------------------------------------------
# Fused single-pass kernel: whole (bn, C, HWp) block resident in VMEM.
# ---------------------------------------------------------------------------
def _grn_fused_kernel(x_ref, gamma_ref, beta_ref, out_ref):
    # x_ref: (bn, C, HWp) -- spatial on lanes (lane-dense), channels on sublanes.
    xf = x_ref[...].astype(jnp.float32)
    # Per-(sample, channel) spatial L2 norm: lane (XLU) reduction over HWp.
    gx = jnp.sqrt(jnp.sum(xf * xf, axis=-1, keepdims=True))        # (bn, C, 1)
    # Per-sample channel mean (sublane reduction); eps placement matches torch.
    nx = gx / (jnp.mean(gx, axis=1, keepdims=True) + _EPS)         # (bn, C, 1)
    # gamma * x * nx + beta + x  ==  x * (gamma * nx + 1) + beta
    scale = gamma_ref[...].astype(jnp.float32) * nx + 1.0          # (bn, C, 1)
    beta = beta_ref[...].astype(jnp.float32)
    if x_ref.dtype == jnp.float32:
        out_ref[...] = xf * scale + beta
    else:
        # Re-read x in its native dtype so the f32 upcast above is dead before
        # the apply: halves live VMEM/vreg pressure for bf16/fp8 inputs.
        xs = x_ref[...]
        out_ref[...] = (xs * scale.astype(xs.dtype)
                        + beta.astype(xs.dtype)).astype(out_ref.dtype)


# ---------------------------------------------------------------------------
# Two-pass fallback for images too large to fit one VMEM block.
# ---------------------------------------------------------------------------
def _grn_ssq_kernel(x_ref, ssq_ref):
    # Per-(n, c) spatial sum of squares, HW tiled; resident f32 accumulator.
    @pl.when(pl.program_id(1) == 0)
    def _():
        ssq_ref[...] = jnp.zeros_like(ssq_ref)

    xf = x_ref[...].astype(jnp.float32)
    ssq_ref[...] += jnp.sum(xf * xf, axis=-1, keepdims=True)


def _grn_apply_kernel(x_ref, scale_ref, beta_ref, out_ref):
    xf = x_ref[...].astype(jnp.float32)
    out_ref[...] = (xf * scale_ref[...].astype(jnp.float32)
                    + beta_ref[...].astype(jnp.float32)).astype(out_ref.dtype)


# ---------------------------------------------------------------------------
# Wrapper
# ---------------------------------------------------------------------------
def _vmem_capacity_bytes():
    try:
        return int(pltpu.get_tpu_info().vmem_capacity_bytes)
    except Exception:
        return 64 << 20   # conservative (v7x-sized) default


def _round_up(a, b):
    return (a + b - 1) // b * b


def _grn_fused(x, gamma, beta, *, N, C, HW, HWp, per_image_bytes,
               vmem_budget_bytes, vmem_cap):
    if HWp != HW:
        x = jnp.pad(x, ((0, 0), (0, 0), (0, HWp - HW)))

    # Batch several images per grid step (amortize ~0.35us/step overhead), but
    # never collapse the grid to a single step: >= 2 steps keeps the in/out
    # double-buffer overlapped and lets a multi-TC chip shard the batch axis.
    max_bn = max(1, N // 2)
    bn = 1
    for cand in range(1, max_bn + 1):
        if N % cand == 0 and cand * per_image_bytes <= vmem_budget_bytes:
            bn = cand

    block_bytes = bn * per_image_bytes + 2 * C * 4
    vmem_limit = int(min(max(block_bytes + (4 << 20), 16 << 20), vmem_cap // 2))

    cost = pl.CostEstimate(
        flops=4 * N * C * HWp,
        transcendentals=N * C,
        bytes_accessed=2 * N * C * HWp * x.dtype.itemsize)

    return pl.pallas_call(
        _grn_fused_kernel,
        out_shape=jax.ShapeDtypeStruct((N, C, HWp), x.dtype),
        grid=(N // bn,),
        in_specs=[
            pl.BlockSpec((bn, C, HWp), lambda n: (n, 0, 0)),   # x
            pl.BlockSpec((1, C, 1), lambda n: (0, 0, 0)),      # gamma
            pl.BlockSpec((1, C, 1), lambda n: (0, 0, 0)),      # beta
        ],
        out_specs=pl.BlockSpec((bn, C, HWp), lambda n: (n, 0, 0)),
        compiler_params=pltpu.CompilerParams(
            dimension_semantics=("parallel",),
            vmem_limit_bytes=vmem_limit,
        ),
        cost_estimate=cost,
    )(x, gamma, beta)


def _grn_two_pass(x, gamma, beta, *, N, C, HW, per_elem_bytes,
                  vmem_budget_bytes, vmem_cap):
    # Spatial tile: largest multiple of 128 lanes that fits the budget.
    per_col_bytes = C * per_elem_bytes
    thw = max(128, (max(vmem_budget_bytes // per_col_bytes, 1) // 128) * 128)
    HWp = _round_up(HW, thw)
    thw = min(thw, HWp)
    if HWp != HW:
        x = jnp.pad(x, ((0, 0), (0, 0), (0, HWp - HW)))
    n_hw = HWp // thw

    block_bytes = C * thw * per_elem_bytes
    vmem_limit = int(min(max(block_bytes + (4 << 20), 16 << 20), vmem_cap // 2))
    itemsize = x.dtype.itemsize

    # Pass 1: per-(n, c) spatial sum of squares (reduction axis last).
    ssq = pl.pallas_call(
        _grn_ssq_kernel,
        out_shape=jax.ShapeDtypeStruct((N, C, 1), jnp.float32),
        grid=(N, n_hw),
        in_specs=[pl.BlockSpec((1, C, thw), lambda n, k: (n, 0, k))],
        out_specs=pl.BlockSpec((1, C, 1), lambda n, k: (n, 0, 0)),
        compiler_params=pltpu.CompilerParams(
            dimension_semantics=("parallel", "arbitrary"),
            vmem_limit_bytes=vmem_limit),
        cost_estimate=pl.CostEstimate(
            flops=2 * N * C * HWp, transcendentals=0,
            bytes_accessed=N * C * HWp * itemsize),
    )(x)

    # Tiny per-(n, c) norm math in plain XLA.
    gx = jnp.sqrt(ssq)                                        # (N, C, 1)
    nx = gx / (jnp.mean(gx, axis=1, keepdims=True) + _EPS)    # (N, C, 1)
    scale = gamma * nx + 1.0                                  # (N, C, 1) f32

    # Pass 2: elementwise apply of the per-(n, c) scale.
    return pl.pallas_call(
        _grn_apply_kernel,
        out_shape=jax.ShapeDtypeStruct((N, C, HWp), x.dtype),
        grid=(N, n_hw),
        in_specs=[
            pl.BlockSpec((1, C, thw), lambda n, k: (n, 0, k)),   # x
            pl.BlockSpec((1, C, 1), lambda n, k: (n, 0, 0)),     # scale
            pl.BlockSpec((1, C, 1), lambda n, k: (0, 0, 0)),     # beta
        ],
        out_specs=pl.BlockSpec((1, C, thw), lambda n, k: (n, 0, k)),
        compiler_params=pltpu.CompilerParams(
            dimension_semantics=("parallel", "parallel"),
            vmem_limit_bytes=vmem_limit),
        cost_estimate=pl.CostEstimate(
            flops=2 * N * C * HWp, transcendentals=0,
            bytes_accessed=2 * N * C * HWp * itemsize),
    )(x, scale, beta)


def grn_pallas(x_nchw, gamma, beta, *, vmem_budget_bytes=None):
    """GRN forward. x_nchw: (N, C, H, W); gamma/beta: (1, C, 1, 1) or (C,)."""
    N, C, H, W = x_nchw.shape
    HW = H * W
    itemsize = x_nchw.dtype.itemsize

    # Generation-aware VMEM budget (v7x: 64 MiB/TC; v5e/v6e: 128 MiB/TC).
    vmem_cap = _vmem_capacity_bytes()
    if vmem_budget_bytes is None:
        vmem_budget_bytes = min(vmem_cap // 3, 48 << 20)

    gamma = gamma.reshape(1, C, 1).astype(jnp.float32)
    beta = beta.reshape(1, C, 1).astype(jnp.float32)

    # Per-element VMEM cost of a block: double-buffered in + out blocks plus
    # the in-kernel f32 temporary (matters for sub-f32 input dtypes).
    per_elem_bytes = 4 * itemsize + 4

    # Lane-dense spatial axis: pad H*W up to a multiple of 128.
    hwp_fused = _round_up(HW, 128)
    per_image_bytes = C * hwp_fused * per_elem_bytes

    x = x_nchw.reshape(N, C, HW)   # contiguous reshape, no transpose

    if per_image_bytes <= vmem_budget_bytes:
        out = _grn_fused(x, gamma, beta, N=N, C=C, HW=HW, HWp=hwp_fused,
                         per_image_bytes=per_image_bytes,
                         vmem_budget_bytes=vmem_budget_bytes,
                         vmem_cap=vmem_cap)
    else:
        out = _grn_two_pass(x, gamma, beta, N=N, C=C, HW=HW,
                            per_elem_bytes=per_elem_bytes,
                            vmem_budget_bytes=vmem_budget_bytes,
                            vmem_cap=vmem_cap)

    return out[:, :, :HW].reshape(N, C, H, W)


def grn_ref(x, gamma, beta):
    # Pure-JAX reference mirroring the PyTorch forward.
    gx = jnp.sqrt(jnp.sum(x * x, axis=(2, 3), keepdims=True))
    nx = gx / (jnp.mean(gx, axis=1, keepdims=True) + 1e-6)
    g = gamma.reshape(1, -1, 1, 1)
    b = beta.reshape(1, -1, 1, 1)
    return g * x * nx + b + x


if __name__ == "__main__":
    key = jax.random.PRNGKey(0)
    kx, kg, kb, kx2 = jax.random.split(key, 4)

    # ---- Main check: fused single-pass path (H*W already a multiple of 128).
    N, C, H, W = 2, 32, 16, 16
    x = jax.random.normal(kx, (N, C, H, W), jnp.float32)
    # NOTE: nn.Parameter zeros for gamma/beta would make GRN an identity map;
    # use small random values here to exercise the full compute path.
    gamma = 0.1 * jax.random.normal(kg, (1, C, 1, 1), jnp.float32)
    beta = 0.1 * jax.random.normal(kb, (1, C, 1, 1), jnp.float32)

    out = jax.block_until_ready(grn_pallas(x, gamma, beta))
    ref = jax.block_until_ready(grn_ref(x, gamma, beta))
    assert out.shape == (N, C, H, W)
    err = float(jnp.max(jnp.abs(out - ref)))
    assert jnp.allclose(out, ref, atol=1e-5, rtol=1e-5), err

    # ---- Robustness check (a): fused path with lane padding (12*12 = 144).
    x2 = jax.random.normal(kx2, (N, C, 12, 12), jnp.float32)
    out2 = jax.block_until_ready(grn_pallas(x2, gamma, beta))
    ref2 = grn_ref(x2, gamma, beta)
    assert jnp.allclose(out2, ref2, atol=1e-5, rtol=1e-5)

    # ---- Robustness check (b): two-pass tiled fallback (forced tiny budget).
    out3 = jax.block_until_ready(
        grn_pallas(x, gamma, beta, vmem_budget_bytes=100 * 1024))
    assert jnp.allclose(out3, ref, atol=1e-5, rtol=1e-5)

    print("KERNEL_OK")
</pallas_src>

<mosaic_0001>
module attributes {stable_mosaic.version = 11 : i64} {
  func.func @_grn_fused_kernel(%arg0: i32, %arg1: memref<1x32x256xf32, #tpu.memory_space<vmem>>, %arg2: memref<1x32x1xf32, #tpu.memory_space<vmem>>, %arg3: memref<1x32x1xf32, #tpu.memory_space<vmem>>, %arg4: memref<1x32x256xf32, #tpu.memory_space<vmem>>) attributes {dimension_semantics = [#tpu.dimension_semantics<parallel>], iteration_bounds = array<i64: 2>, scalar_prefetch = 0 : i64, scratch_operands = 0 : i64, tpu.core_type = #tpu.core_type<tc>, window_params = [{transform_indices = @transform_0, window_bounds = array<i64: 1, 32, 256>}, {pipeline_mode = #tpu.pipeline_mode<synchronous>, transform_indices = @transform_1, window_bounds = array<i64: 1, 32, 1>}, {pipeline_mode = #tpu.pipeline_mode<synchronous>, transform_indices = @transform_2, window_bounds = array<i64: 1, 32, 1>}, {transform_indices = @transform_3, window_bounds = array<i64: 1, 32, 256>}]} {
    %c0 = arith.constant 0 : index
    %c0_0 = arith.constant 0 : index
    %c0_1 = arith.constant 0 : index
    %0 = vector.load %arg1[%c0, %c0_0, %c0_1] : memref<1x32x256xf32, #tpu.memory_space<vmem>>, vector<1x32x256xf32>
    %1 = arith.mulf %0, %0 : vector<1x32x256xf32>
    %cst = arith.constant dense<0.000000e+00> : vector<1x32xf32>
    %2 = vector.multi_reduction <add>, %1, %cst [2] : vector<1x32x256xf32> to vector<1x32xf32>
    %3 = vector.shape_cast %2 : vector<1x32xf32> to vector<1x32x1xf32>
    %4 = math.sqrt %3 : vector<1x32x1xf32>
    %cst_2 = arith.constant dense<0.000000e+00> : vector<1x1xf32>
    %5 = vector.multi_reduction <add>, %4, %cst_2 [1] : vector<1x32x1xf32> to vector<1x1xf32>
    %6 = vector.shape_cast %5 : vector<1x1xf32> to vector<1x1x1xf32>
    %cst_3 = arith.constant 3.200000e+01 : f32
    %7 = vector.broadcast %cst_3 : f32 to vector<1x1x1xf32>
    %8 = arith.divf %6, %7 : vector<1x1x1xf32>
    %cst_4 = arith.constant 9.99999997E-7 : f32
    %9 = vector.broadcast %cst_4 : f32 to vector<1x1x1xf32>
    %10 = arith.addf %8, %9 : vector<1x1x1xf32>
    %11 = vector.broadcast %10 : vector<1x1x1xf32> to vector<1x32x1xf32>
    %12 = arith.divf %4, %11 : vector<1x32x1xf32>
    %c0_5 = arith.constant 0 : index
    %c0_6 = arith.constant 0 : index
    %c0_7 = arith.constant 0 : index
    %13 = vector.load %arg2[%c0_5, %c0_6, %c0_7] : memref<1x32x1xf32, #tpu.memory_space<vmem>>, vector<1x32x1xf32>
    %14 = arith.mulf %13, %12 : vector<1x32x1xf32>
    %cst_8 = arith.constant 1.000000e+00 : f32
    %15 = vector.broadcast %cst_8 : f32 to vector<1x32x1xf32>
    %16 = arith.addf %14, %15 : vector<1x32x1xf32>
    %c0_9 = arith.constant 0 : index
    %c0_10 = arith.constant 0 : index
    %c0_11 = arith.constant 0 : index
    %17 = vector.load %arg3[%c0_9, %c0_10, %c0_11] : memref<1x32x1xf32, #tpu.memory_space<vmem>>, vector<1x32x1xf32>
    %18 = vector.broadcast %16 : vector<1x32x1xf32> to vector<1x32x256xf32>
    %19 = arith.mulf %0, %18 : vector<1x32x256xf32>
    %20 = vector.broadcast %17 : vector<1x32x1xf32> to vector<1x32x256xf32>
    %21 = arith.addf %19, %20 : vector<1x32x256xf32>
    %c0_12 = arith.constant 0 : index
    %c0_13 = arith.constant 0 : index
    %c0_14 = arith.constant 0 : index
    %22 = vector.load %arg4[%c0_12, %c0_13, %c0_14] : memref<1x32x256xf32, #tpu.memory_space<vmem>>, vector<1x32x256xf32>
    tpu.vector_store %arg4[%c0_12, %c0_13, %c0_14], %21 {strides = array<i32>} : memref<1x32x256xf32, #tpu.memory_space<vmem>>, vector<1x32x256xf32>,
    return
  }
  func.func @transform_0(%arg0: i32) -> (i32, i32, i32) {
    %c0_i32 = arith.constant 0 : i32
    %c0_i32_0 = arith.constant 0 : i32
    %c0_i32_1 = arith.constant 0 : i32
    return %arg0, %c0_i32, %c0_i32_0 : i32, i32, i32
  }
  func.func @transform_1(%arg0: i32) -> (i32, i32, i32) {
    %c0_i32 = arith.constant 0 : i32
    %c0_i32_0 = arith.constant 0 : i32
    %c0_i32_1 = arith.constant 0 : i32
    %c0_i32_2 = arith.constant 0 : i32
    return %c0_i32, %c0_i32_0, %c0_i32_1 : i32, i32, i32
  }
  func.func @transform_2(%arg0: i32) -> (i32, i32, i32) {
    %c0_i32 = arith.constant 0 : i32
    %c0_i32_0 = arith.constant 0 : i32
    %c0_i32_1 = arith.constant 0 : i32
    %c0_i32_2 = arith.constant 0 : i32
    return %c0_i32, %c0_i32_0, %c0_i32_1 : i32, i32, i32
  }
  func.func @transform_3(%arg0: i32) -> (i32, i32, i32) {
    %c0_i32 = arith.constant 0 : i32
    %c0_i32_0 = arith.constant 0 : i32
    %c0_i32_1 = arith.constant 0 : i32
    return %arg0, %c0_i32, %c0_i32_0 : i32, i32, i32
  }
}

</mosaic_0001>

<bundles_post_ra>
// kernel: tpu_custom_call.1
= control target key start
LH: loop header
LB: loop body
LE: loop exit
PB: predicated region body
PF: predicated region fallthrough
CT: control target
= control target key end

     0   :  { %8 = vsyncpa [#allocation3], 0  ;;  %s851_s0 = inlined_call_operand.hbm [shape: f32[2,32,256], index: 0, kind: input, shape index: {}]   ;;  %s852_s1 = inlined_call_operand.vmem [shape: f32[1,32,1], index: 1, kind: input, shape index: {}]   ;;  %s853_s2 = inlined_call_operand.vmem [shape: f32[1,32,1], index: 2, kind: input, shape index: {}]   ;;  %s854_s3 = inlined_call_operand.hbm [shape: f32[2,32,256], index: 3, kind: output, shape index: {}]  }
   0x1   :  { %10 = vsyncpa [#allocation3 + $0x1], 0 }
   0x2   :  { %11 = vsyncpa [#allocation4], 0 }
   0x3   :  { %13 = vsyncpa [#allocation4 + $0x1], 0  ;;  %s629_s12 = smov 0   ;;  %s631_s13 = smov 0  }
   0x4   :  { %s633_s14 = smov 0   ;;  %s635_s15 = smov 0  }
   0x5 LB: > { %s650_s16 = sadd.s32 4294967295, %s600_s15   ;;  %s429_s17 = sadd.s32 4294967294, %s600_s15   ;;  %s600_s15 = sphi %s635_s15, %s869_s15   ;;  %s596_s14 = sphi %s633_s14, %s868_s14   ;;  %s592_s13 = sphi %s631_s13, %s867_s13   ;;  %s588_s12 = sphi %s629_s12, %s866_s12  }
   0x6   : > { %s654_s18 = sadd.s32 1, %s600_s15   ;;  %s26_s19 = sadd.s32 1, %s596_s14 }
   0x7   : > { %s23_s20 = ssub.s32 %s600_s15, %s654_s18  ;;  %p33_p0 = scmp.ne.s32.totalorder %s596_s14, %s592_s13 }
   0x8   : > { %p24_p1 = scmp.eq.s32.totalorder %s23_s20, 0  ;;  %p34_p2 = scmp.eq.s32.totalorder %s600_s15, 0 }
   0x9   : > { %p39_p3 = scmp.ne.s32.totalorder %s592_s13, %s588_s12  ;;  %p40_p4 = scmp.eq.s32.totalorder %s650_s16, 0 }
   0xa   : > { %s666_s21 = scalar_select %p24_p1, %s596_s14, %s26_s19  }
   0xb   : > { %p668_p5 = por %p34_p2, %p33_p0  ;;  %p672_p6 = por %p40_p4, %p39_p3 }
   0xc   : > { %p105_p7 = scmp.eq.s32.totalorder %s650_s16, 1  ;;  %p111_p8 = scmp.eq.s32.totalorder %s429_s17, 1 }
   0xd   : > { %s858_s23 = scalar_select %p672_p6, 1, 0 }
   0xe   : > { %p457_p10 = scmp.lt.s32.totalorder %s600_s15, 2  ;;  %p679_p11 = por %p105_p7, %p33_p0 }
   0xf   : > { %p683_p12 = por %p111_p8, %p39_p3  ;;  %s137_s26 = sand.u32 1, %s596_s14  }
  0x10   : > { %s859_s24 = scalar_select %p679_p11, 1, 0 }
  0x11   : > { %s860_s25 = scalar_select %p683_p12, 1, 0 }
  0x12   : > { %s443_s27 = sshll.u32 %s600_s15, 10  ;;  %s432_s28 = sshll.u32 %s137_s26, 6 }
  0x13   : > { %s692_s4 = scalar_lea.hbm %s851_s0, %s443_s27  ;;  %s141_s5 = scalar_lea.vmem [#allocation2], %s432_s28 }
  0x14   : > { %s148_s6 = sshll.u32 %s141_s5, 4  ;;  %p696_p13 = pnand %p457_p10, %p668_p5  ;;  %s700_s6 = int_to_ptr.vmem [resolvable:$true] %s148_s6 }
  0x15   : > { %s702_s8 = scalar_lea.sflag [#allocation3], %s137_s26  ;;  %s508_s9 = scalar_lea.hbm %s692_s4, 1024 }
  0x16   : > { %p509_p0 = scmp.ne.s32.totalorder %s692_s4, %s508_s9  ;;  %p510_p1 = pneg %p696_p13 }
  0x17   : > { %s513_s17 = scalar_lea.hbm %s851_s0, 2048  ;;  %p514_p4 = scmp.lt.s32.totalorder %s692_s4, %s851_s0 }
  0x18   : > { %p511_p2 = pnand %p510_p1, %p509_p0  ;;  %p515_p5 = scmp.lt.s32.totalorder %s513_s17, %s508_s9 }
  0x1a   : > { %p512_p3 = pneg %p511_p2  ;;  %p516_p7 = por %p515_p5, %p514_p4 }
  0x1c   : > { %p517_p8 = pnand %p516_p7, %p512_p3 }
  0x1e   : > { %520 = shalt.err (!%p517_p8)
}
  0x1f   : > { %s521_s22 = scalar_lea.vmem %s700_s6, 1024  ;;  %s602_s26 = smov [#allocation2]  }
  0x20   : > { %p522_p10 = scmp.ne.s32.totalorder %s700_s6, %s521_s22  ;;  %s526_s27 = sshll.u32 %s602_s26, 4  ;;  %s527_s27 = int_to_ptr.vmem [resolvable:$false] %s526_s27 }
  0x21   : > { %s528_s28 = scalar_lea.vmem %s527_s27, 2048  ;;  %p529_p2 = scmp.lt.s32.totalorder %s700_s6, %s527_s27 }
  0x22   : > { %p524_p9 = pnand %p522_p10, %p510_p1  ;;  %p530_p12 = scmp.lt.s32.totalorder %s528_s28, %s521_s22 }
  0x24   : > { %p525_p0 = pneg %p524_p9  ;;  %p531_p11 = por %p530_p12, %p529_p2 }
  0x26   : > { %p532_p6 = pnand %p531_p11, %p525_p0 }
  0x28   : > { %535 = shalt.err (!%p532_p6)
}
  0x29   : > { %s603_s29 = smov 256   ;;  %s604_s30 = smov 16  }
  0x2a   : > { %452 = dma.hbm_to_vmem [thread:$0]  (!%p696_p13), %s692_s4, 1024, %s700_s6, %s702_s8, %s603_s29, %s603_s29, %s604_s30  }
  0x2b   : > { %p435_p9 = scmp.ge.s32.totalorder %s600_s15, 1  ;;  %p156_p1 = scmp.lt.s32.totalorder %s600_s15, 3 }
  0x2d   : > { %p157_p3 = pnand %p435_p9, %p156_p1 }
  0x2e   : > { %s726_s5 = sand.u32 (!%p157_p3), 1, %s592_s13   ;;  %p862_p6 = scmp.ne.s32.totalorder (!%p157_p3), %s858_s23, 0 }
  0x2f   : > { %160 = sbr.rel (%p157_p3) target bundleno = 413 (0x19d), region = 32  ;;  %s436_s9 = sshll.u32 (!%p157_p3), %s726_s5, 6 }
  0x30   : > { %s163_s10 = scalar_lea.sflag (!%p157_p3), [#allocation3], %s726_s5  ;;  %s166_s11 = scalar_lea.vmem (!%p157_p3), [#allocation2], %s436_s9 }
  0x34   : > { %579 = dma.done.wait (%p862_p6), %s163_s10, 1024  }
  0x35   : > { %581 = vsyncadd (%p862_p6), %s163_s10, 4294966272  ;;  %v736_v0 = vld [vmem:[%s166_s11 + $0x20] sm:$0xff]  ;;  %v738_v1 = vld [vmem:[%s166_s11 + $0x28] sm:$0xff]  ;;  %v605_v21 = vmov 0   ;;  %s188_s23 = scalar_lea.vmem [#allocation5], %s436_s9  ;;  %s444_s4 = sshll.u32 %s650_s16, 10 }
  0x36   : > { %v740_v2 = vld [vmem:[%s166_s11] sm:$0xff]  ;;  %v201_v3 = vmul.f32 %v736_v0, %v736_v0  ;;  %v202_v4 = vmul.f32 %v738_v1, %v738_v1  ;;  %v746_v5 = vld [vmem:[%s166_s11 + $0x8] sm:$0xff]  ;;  %v750_v7 = vld [vmem:[%s166_s11 + $0x30] sm:$0xff]  ;;  %497 = vset.pattern.permute.xlu1 %v605_v21  ;;  %496 = vset.pattern.permute.xlu0 %v605_v21  ;;  %s356_s6 = sshll.u32 %s188_s23, 4  ;;  %s806_s8 = scalar_lea.hbm %s854_s3, %s444_s4  ;;  %s808_s6 = int_to_ptr.vmem [resolvable:$true] %s356_s6 }
  0x37   : > { %v197_v6 = vmul.f32 %v740_v2, %v740_v2  ;;  %v752_v8 = vld [vmem:[%s166_s11 + $0x38] sm:$0xff]  ;;  %v198_v9 = vmul.f32 %v746_v5, %v746_v5  ;;  %v203_v10 = vmul.f32 %v750_v7, %v750_v7  ;;  %v760_v12 = vld [vmem:[%s166_s11 + $0x10] sm:$0xff]  ;;  %v274_v20 = vld [vmem:[%s853_s2] sm:$0xff]  ;;  %s343_s16 = scalar_lea.sflag [#allocation4], %s726_s5  ;;  %s536_s17 = scalar_lea.vmem %s808_s6, 1024 }
  0x38   : > { %v204_v11 = vmul.f32 %v752_v8, %v752_v8  ;;  %v762_v13 = vld [vmem:[%s166_s11 + $0x18] sm:$0xff]  ;;  %v211_v14 = vadd.f32 %v202_v4, %v201_v3  ;;  %v199_v15 = vmul.f32 %v760_v12, %v760_v12  ;;  %v275_v22 = vld [vmem:[%s853_s2 + $0x8] sm:$0xff]  ;;  %v276_v23 = vld [vmem:[%s853_s2 + $0x10] sm:$0xff]  ;;  %p537_p11 = scmp.ne.s32.totalorder %s808_s6, %s536_s17  ;;  %p863_p12 = scmp.ne.s32.totalorder %s859_s24, 0 }
  0x39   : > { %v200_v16 = vmul.f32 %v762_v13, %v762_v13  ;;  %v205_v17 = vadd.f32 %v198_v9, %v197_v6  ;;  %v263_v60 = vld [vmem:[%s852_s1 + $0x8] sm:$0xff]  ;;  %v262_v61 = vld [vmem:[%s852_s1] sm:$0xff]  ;;  %v264_v4 = vld [vmem:[%s852_s1 + $0x10] sm:$0xff]  ;;  %s606_s19 = smov [#allocation5]  }
  0x3a   : > { %212 = vadd.xlane.f32.xlu1 %v211_v14  ;;  %v214_v18 = vadd.f32 %v204_v11, %v203_v10  ;;  %p538_p13 = pnand %p537_p11, %p863_p12  ;;  %s540_s20 = sshll.u32 %s606_s19, 4  ;;  %s541_s20 = int_to_ptr.vmem [resolvable:$false] %s540_s20 }
  0x3b   : > { %206 = vadd.xlane.f32.xlu0 %v205_v17  ;;  %v208_v19 = vadd.f32 %v200_v16, %v199_v15  ;;  %v265_v16 = vld [vmem:[%s852_s1 + $0x18] sm:$0xff]  ;;  %s542_s22 = scalar_lea.vmem %s541_s20, 2048  ;;  %p543_p5 = scmp.lt.s32.totalorder %s808_s6, %s541_s20 }
  0x3c   : > { %p539_p4 = pneg %p538_p13  ;;  %p544_p7 = scmp.lt.s32.totalorder %s542_s22, %s536_s17 }
  0x3e   : > { %215 = vadd.xlane.f32.xlu1 %v214_v18  ;;  %p545_p8 = por %p544_p7, %p543_p5 }
  0x3f   : > { %209 = vadd.xlane.f32.xlu0 %v208_v19 }
  0x40   : > { %p546_p10 = pnand %p545_p8, %p539_p4 }
  0x4f   : > { %308 = vperm.xlu1 %497, %v274_v20   ;;  %v277_v20 = vld [vmem:[%s853_s2 + $0x18] sm:$0xff] }
  0x53   : > { %313 = vperm.xlu1 %497, %v275_v22  }
  0x57   : > { %318 = vperm.xlu1 %497, %v276_v23  }
  0xc3   : > { %v213_v24 = vpop.xlane.xlu1 %212 }
  0xc4   : > { %498 = vrsqrt.f32 %v213_v24  ;;  %v207_v25 = vpop.xlane.xlu0 %206  ;;  %vm233_vm1 = vcmp.eq.f32.partialorder %v213_v24, inf  ;;  %v236_v41 = vand.u32 2147483648, %v213_v24  ;;  %vm235_vm6 = vcmp.eq.f32.partialorder %v213_v24, 0.0 }
  0xc5   : > { %500 = vrsqrt.f32 %v207_v25  ;;  %vm219_vm0 = vcmp.eq.f32.partialorder %v207_v25, inf  ;;  %v222_v37 = vand.u32 2147483648, %v207_v25  ;;  %vm221_vm3 = vcmp.eq.f32.partialorder %v207_v25, 0.0 }
  0xc7   : > { %v216_v26 = vpop.xlane.xlu1 %215 }
  0xc8   : > { %502 = vrsqrt.f32 %v216_v26  ;;  %v210_v27 = vpop.xlane.xlu0 %209  ;;  %vm240_vm5 = vcmp.eq.f32.partialorder %v216_v26, inf  ;;  %v243_v46 = vand.u32 2147483648, %v216_v26  ;;  %vm242_vm7 = vcmp.eq.f32.partialorder %v216_v26, 0.0 }
  0xc9   : > { %504 = vrsqrt.f32 %v210_v27  ;;  %vm226_vm2 = vcmp.eq.f32.partialorder %v210_v27, inf  ;;  %v229_v38 = vand.u32 2147483648, %v210_v27  ;;  %vm228_vm4 = vcmp.eq.f32.partialorder %v210_v27, 0.0 }
  0xcb   : > { %v309_v21 = vpop.permute.xlu1 %308 }
  0xcf   : > { %v314_v22 = vpop.permute.xlu1 %313 }
  0xd1   : > { %v499_v28 = vpop.eup %498 }
  0xd2   : > { %v501_v29 = vpop.eup %500  ;;  %v232_v32 = vmul.f32 %v499_v28, %v213_v24 }
  0xd3   : > { %v218_v30 = vmul.f32 %v501_v29, %v207_v25  ;;  %v319_v23 = vpop.permute.xlu1 %318 }
  0xd4   : > { %v234_v39 = vsel %vm233_vm1, %v213_v24, %v232_v32 }
  0xd5   : > { %v503_v31 = vpop.eup %502  ;;  %v220_v36 = vsel %vm219_vm0, %v207_v25, %v218_v30  ;;  %v237_v47 = vsel %vm235_vm6, %v236_v41, %v234_v39 }
  0xd6   : > { %v505_v33 = vpop.eup %504  ;;  %v239_v34 = vmul.f32 %v503_v31, %v216_v26  ;;  %v223_v42 = vsel %vm221_vm3, %v222_v37, %v220_v36 }
  0xd7   : > { %v225_v35 = vmul.f32 %v505_v33, %v210_v27 }
  0xd8   : > { %v241_v44 = vsel %vm240_vm5, %v216_v26, %v239_v34 }
  0xd9   : > { %v227_v40 = vsel %vm226_vm2, %v210_v27, %v225_v35  ;;  %v244_v49 = vsel %vm242_vm7, %v243_v46, %v241_v44 }
  0xda   : > { %v230_v43 = vsel %vm228_vm4, %v229_v38, %v227_v40 }
  0xdb   : > { %v245_v45 = vadd.f32 %v230_v43, %v223_v42 }
  0xdd   : > { %v246_v48 = vadd.f32 %v245_v45, %v237_v47 }
  0xdf   : > { %v247_v50 = vadd.f32 %v246_v48, %v244_v49 }
  0xe1   : > { %v248_v51 = vrot.slane %v247_v50, 4 }
  0xe3   : > { %v249_v52 = vadd.f32 %v248_v51, %v247_v50 }
  0xe5   : > { %v250_v53 = vrot.slane %v249_v52, 2 }
  0xe7   : > { %v251_v54 = vadd.f32 %v250_v53, %v249_v52 }
  0xe9   : > { %v252_v55 = vrot.slane %v251_v54, 1 }
  0xeb   : > { %v253_v56 = vadd.f32 %v252_v55, %v251_v54 }
  0xed   : > { %v255_v57 = vmul.f32 0.03125, %v253_v56 }
  0xef   : > { %v256_v58 = vadd.f32 1e-06, %v255_v57 }
  0xf1   : > { %506 = vrcp.f32 %v256_v58 }
  0xfe   : > { %v507_v59 = vpop.eup %506 }
  0xff   : > { %v259_v62 = vmul.f32 %v507_v59, %v230_v43  ;;  %v258_v63 = vmul.f32 %v507_v59, %v223_v42  ;;  %v260_v3 = vmul.f32 %v507_v59, %v237_v47  ;;  %v261_v15 = vmul.f32 %v507_v59, %v244_v49 }
 0x101   : > { %v267_v6 = vmul.f32 %v263_v60, %v259_v62  ;;  %v266_v9 = vmul.f32 %v262_v61, %v258_v63  ;;  %v268_v14 = vmul.f32 %v264_v4, %v260_v3  ;;  %v269_v18 = vmul.f32 %v265_v16, %v261_v15 }
 0x103   : > { %v271_v10 = vadd.f32 1.0, %v267_v6  ;;  %v270_v11 = vadd.f32 1.0, %v266_v9  ;;  %v272_v17 = vadd.f32 1.0, %v268_v14  ;;  %v273_v19 = vadd.f32 1.0, %v269_v18 }
 0x105   : > { %285 = vperm.xlu1 %497, %v271_v10   ;;  %280 = vperm.xlu0 %496, %v270_v11  }
 0x109   : > { %290 = vperm.xlu1 %497, %v272_v17  }
 0x10d   : > { %295 = vperm.xlu1 %497, %v273_v19  }
 0x111   : > { %323 = vperm.xlu1 %497, %v277_v20  }
 0x180   : > { %v286_v24 = vpop.permute.xlu1 %285  ;;  %v281_v25 = vpop.permute.xlu0 %280 }
 0x181   : > { %v300_v26 = vmul.f32 %v286_v24, %v760_v12  ;;  %v301_v27 = vmul.f32 %v286_v24, %v762_v13  ;;  %v298_v28 = vmul.f32 %v281_v25, %v740_v2  ;;  %v299_v29 = vmul.f32 %v281_v25, %v746_v5 }
 0x183   : > { %v328_v30 = vadd.f32 %v314_v22, %v300_v26  ;;  %v329_v31 = vadd.f32 %v314_v22, %v301_v27  ;;  %v326_v32 = vadd.f32 %v309_v21, %v298_v28  ;;  %v327_v33 = vadd.f32 %v309_v21, %v299_v29 }
 0x184   : > { %v291_v34 = vpop.permute.xlu1 %290 }
 0x185   : > { %336 = vst [vmem:[%s188_s23 + $0x10] sm:$0xff] %v328_v30  ;;  %337 = vst [vmem:[%s188_s23 + $0x18] sm:$0xff] %v329_v31  ;;  %v302_v12 = vmul.f32 %v291_v34, %v736_v0  ;;  %v303_v13 = vmul.f32 %v291_v34, %v738_v1 }
 0x186   : > { %334 = vst [vmem:[%s188_s23] sm:$0xff] %v326_v32  ;;  %335 = vst [vmem:[%s188_s23 + $0x8] sm:$0xff] %v327_v33 }
 0x187   : > { %v330_v35 = vadd.f32 %v319_v23, %v302_v12  ;;  %v331_v2 = vadd.f32 %v319_v23, %v303_v13 }
 0x188   : > { %v296_v5 = vpop.permute.xlu1 %295 }
 0x189   : > { %338 = vst [vmem:[%s188_s23 + $0x20] sm:$0xff] %v330_v35  ;;  %339 = vst [vmem:[%s188_s23 + $0x28] sm:$0xff] %v331_v2  ;;  %v304_v36 = vmul.f32 %v296_v5, %v750_v7  ;;  %v305_v37 = vmul.f32 %v296_v5, %v752_v8 }
 0x18c   : > { %v324_v38 = vpop.permute.xlu1 %323 }
 0x18d   : > { %v332_v0 = vadd.f32 %v324_v38, %v304_v36  ;;  %v333_v1 = vadd.f32 %v324_v38, %v305_v37 }
 0x18f   : > { %340 = vst [vmem:[%s188_s23 + $0x30] sm:$0xff] %v332_v0  ;;  %341 = vst [vmem:[%s188_s23 + $0x38] sm:$0xff] %v333_v1 }
 0x190   : > { %549 = shalt.err (!%p546_p10)
}
 0x191   : > { %s550_s26 = scalar_lea.hbm %s806_s8, 1024  ;;  %s554_s29 = scalar_lea.hbm %s854_s3, 2048 }
 0x192   : > { %p551_p0 = scmp.ne.s32.totalorder %s806_s8, %s550_s26  ;;  %p555_p1 = scmp.lt.s32.totalorder %s806_s8, %s854_s3 }
 0x193   : > { %p556_p3 = scmp.lt.s32.totalorder %s554_s29, %s550_s26 }
 0x194   : > { %p552_p2 = pnand %p551_p0, %p863_p12 }
 0x195   : > { %p557_p6 = por %p556_p3, %p555_p1 }
 0x196   : > { %p553_p9 = pneg %p552_p2 }
 0x198   : > { %p558_p11 = pnand %p557_p6, %p553_p9 }
 0x19a   : > { %561 = shalt.err (!%p558_p11)
}
 0x19b   : > { %s607_s11 = smov 256   ;;  %s608_s23 = smov 16  }
 0x19c   : > { %447 = dma.vmem_to_hbm [thread:$0]  (%p863_p12), %s808_s6, 1024, %s806_s8, %s343_s16, %s607_s11, %s607_s11, %s608_s23  }
 0x19d PF: > { %s371_s4 = sand.u32 1, %s588_s12   ;;  %p864_p13 = scmp.ne.s32.totalorder %s860_s25, 0 }
 0x19e   : > { %p865_p4 = scmp.ge.s32.totalorder %s600_s15, 2  ;;  %s372_s9 = scalar_lea.sflag [#allocation4], %s371_s4 }
 0x1a0   : > { %p454_p5 = pnand %p865_p4, %p864_p13 }
 0x1a2   : > { %p455_p7 = pneg %p454_p5 }
 0x1a4   : > { %583 = dma.done.wait (%p455_p7), %s372_s9, 1024  }
 0x1a5   : > { %585 = vsyncadd (%p455_p7), %s372_s9, 4294966272  ;;  %p16_p8 = scmp.ge.s32.totalorder %s654_s18, 4   ;;  %s866_s12 = smov %s592_s13 }
 0x1a6   : > { %s867_s13 = smov %s596_s14  ;;  %s868_s14 = smov %s666_s21 }
 0x1a7   : > { %s869_s15 = smov %s654_s18  ;;  %18 = sbr.rel (!%p16_p8) target bundleno = 5 (0x5), region = 77 }
 0x1ac   :  { %377 = vsyncpa [#allocation3], 1 }
 0x1ad   :  { %379 = vsyncpa [#allocation3 + $0x1], 1 }
 0x1ae   :  { %380 = vsyncpa [#allocation4], 1 }
 0x1af   :  { %382 = vsyncpa [#allocation4 + $0x1], 1 }

</bundles_post_ra>
